<compile_context>
chip_gen: v7x
topology: tpu7x:2x2x1
jax: 0.10.0
libtpu: 0.0.40
codegen_flags: <defaults>
</compile_context>

<pallas_src>
import functools

import jax
import jax.numpy as jnp
from jax.experimental import pallas as pl
from jax.experimental.pallas import tpu as pltpu


def _gather_row_kernel(idx_ref, row_ref, out_ref):
    # idx_ref : SMEM scalar-prefetch ref, (B,) int32 (consumed by index_maps only)
    # row_ref : VMEM (1, 1, dim) -- already the requested row thanks to the
    #           data-dependent index_map gather.
    # out_ref : VMEM (1, 1, dim)
    del idx_ref
    out_ref[...] = row_ref[...]


def _status_emb_lookup_impl(indices, emb_table):
    """Batched embedding gather: indices (B,) int -> (B, dim) rows of emb_table."""
    num_entities, dim = emb_table.shape
    b = indices.shape[0]

    # Bounds-safety: Pallas does not runtime-check the gathered row index; an
    # out-of-range dyad index would silently read adjacent memory.
    safe_idx = jnp.clip(indices.astype(jnp.int32), 0, num_entities - 1)

    # View the table / output with a singleton sublane axis so each block's
    # last two dims equal the full array dims (layout-safe for any dim).
    table3 = emb_table.reshape(num_entities, 1, dim)

    grid_spec = pltpu.PrefetchScalarGridSpec(
        num_scalar_prefetch=1,
        grid=(b,),
        in_specs=[
            # Only the needed (1, 1, dim) row is DMA'd per grid step: the
            # scalar-prefetched index is used in the index_map. Block index ==
            # row index because block_shape[0] == 1.
            pl.BlockSpec((1, 1, dim), lambda i, idx: (idx[i], 0, 0)),
        ],
        out_specs=pl.BlockSpec((1, 1, dim), lambda i, idx: (i, 0, 0)),
    )

    out3 = pl.pallas_call(
        _gather_row_kernel,
        out_shape=jax.ShapeDtypeStruct((b, 1, dim), emb_table.dtype),
        grid_spec=grid_spec,
        compiler_params=pltpu.CompilerParams(
            dimension_semantics=("parallel",),
        ),
    )(safe_idx, table3)

    return out3.reshape(b, dim)


# Jit once so repeated lookups pay no retrace / dispatch-build cost.
status_emb_lookup = jax.jit(_status_emb_lookup_impl)


class StatusEmb:
    """JAX/Pallas port of the PyTorch StatusEmb module."""

    def __init__(self, dim, dyad_lut, key):
        self.dyad_lut = dyad_lut
        self.dim = dim
        num_entities = len(dyad_lut)
        # nn.Embedding default init: N(0, 1)
        self.emb_weight = jax.random.normal(
            key, (num_entities, self.dim), dtype=jnp.float32
        )

    def forward(self, dyad):
        """Single lookup, matching the PyTorch forward: returns [1, dim]."""
        idx = jnp.asarray([self.dyad_lut[dyad]], dtype=jnp.int32)
        return status_emb_lookup(idx, self.emb_weight)

    def forward_batch(self, indices):
        """Batched lookup: indices is a (B,) device int32 array -> (B, dim).

        Preferred entry point: amortizes kernel launch / DMA-setup overhead
        and avoids a per-lookup host->device transfer.
        """
        return status_emb_lookup(indices, self.emb_weight)


if __name__ == "__main__":
    key = jax.random.PRNGKey(0)

    # Small, deterministic setup: 16 entities, dim=32.
    num_entities = 16
    dim = 32
    dyad_lut = {("dyad", i): i for i in range(num_entities)}

    module = StatusEmb(dim, dyad_lut, key)

    # --- Single-dyad forward (original PyTorch semantics) ---
    dyad = ("dyad", 5)
    out = module.forward(dyad)
    out = jax.block_until_ready(out)
    ref = module.emb_weight[dyad_lut[dyad]][None, :]
    assert out.shape == (1, dim), out.shape
    assert jnp.allclose(out, ref), "Pallas single-row embedding lookup mismatch"

    # --- Batched forward (amortized launch, one kernel for B lookups) ---
    batch_indices = jnp.asarray([5, 0, 3, 15, 7, 2, 9, 11], dtype=jnp.int32)
    out_b = module.forward_batch(batch_indices)
    out_b = jax.block_until_ready(out_b)
    ref_b = module.emb_weight[batch_indices]
    assert out_b.shape == (batch_indices.shape[0], dim), out_b.shape
    assert jnp.allclose(out_b, ref_b), "Pallas batched embedding lookup mismatch"

    print("KERNEL_OK")
</pallas_src>

<mosaic_0001>
module attributes {stable_mosaic.version = 11 : i64} {
  func.func @_gather_row_kernel(%arg0: i32, %arg1: memref<1xi32, #tpu.memory_space<smem>>, %arg2: memref<1x1x32xf32, #tpu.memory_space<vmem>>, %arg3: memref<1x1x32xf32, #tpu.memory_space<vmem>>) attributes {dimension_semantics = [#tpu.dimension_semantics<parallel>], iteration_bounds = array<i64: 1>, scalar_prefetch = 1 : i64, scratch_operands = 0 : i64, tpu.core_type = #tpu.core_type<tc>, window_params = [{transform_indices = @transform_0, window_bounds = array<i64: 1, 1, 32>}, {transform_indices = @transform_1, window_bounds = array<i64: 1, 1, 32>}]} {
    %c0 = arith.constant 0 : index
    %c0_0 = arith.constant 0 : index
    %c0_1 = arith.constant 0 : index
    %0 = vector.load %arg2[%c0, %c0_0, %c0_1] : memref<1x1x32xf32, #tpu.memory_space<vmem>>, vector<1x1x32xf32>
    %c0_2 = arith.constant 0 : index
    %c0_3 = arith.constant 0 : index
    %c0_4 = arith.constant 0 : index
    %1 = vector.load %arg3[%c0_2, %c0_3, %c0_4] : memref<1x1x32xf32, #tpu.memory_space<vmem>>, vector<1x1x32xf32>
    tpu.vector_store %arg3[%c0_2, %c0_3, %c0_4], %0 {strides = array<i32>} : memref<1x1x32xf32, #tpu.memory_space<vmem>>, vector<1x1x32xf32>,
    return
  }
  func.func @transform_0(%arg0: i32, %arg1: memref<1xi32, #tpu.memory_space<smem>>) -> (i32, i32, i32) {
    %0 = arith.index_cast %arg0 : i32 to index
    %1 = memref.load %arg1[%0] : memref<1xi32, #tpu.memory_space<smem>>
    %c0_i32 = arith.constant 0 : i32
    %c0_i32_0 = arith.constant 0 : i32
    %c0_i32_1 = arith.constant 0 : i32
    return %1, %c0_i32, %c0_i32_0 : i32, i32, i32
  }
  func.func @transform_1(%arg0: i32, %arg1: memref<1xi32, #tpu.memory_space<smem>>) -> (i32, i32, i32) {
    %c0_i32 = arith.constant 0 : i32
    %c0_i32_0 = arith.constant 0 : i32
    %c0_i32_1 = arith.constant 0 : i32
    return %arg0, %c0_i32, %c0_i32_0 : i32, i32, i32
  }
}

</mosaic_0001>

<bundles_post_ra>
// kernel: _status_emb_lookup_impl.1
= control target key start
LH: loop header
LB: loop body
LE: loop exit
PB: predicated region body
PF: predicated region fallthrough
CT: control target
= control target key end

     0   :  { %8 = vsyncpa [#allocation5], 0  ;;  %s141_s0 = inlined_call_operand.<no memory space> [shape: s32[1], index: 0, kind: input, shape index: {}]   ;;  %s142_s1 = inlined_call_operand.hbm [shape: f32[16,1,32], index: 1, kind: input, shape index: {}]   ;;  %s143_s2 = inlined_call_operand.hbm [shape: f32[1,1,32], index: 2, kind: output, shape index: {}]  }
   0x1   :  { %9 = vsyncpa [#allocation6], 0  ;;  %s47_s11 = sshll.u32 %s141_s0, 4  ;;  %s100_s15 = smov [#allocation4]  }
   0x2   :  { %s17_s14 = scalar_lea.hbm %s142_s1, %s47_s11  ;;  %s19_s16 = sshll.u32 %s100_s15, 4  ;;  %s20_s16 = int_to_ptr.vmem [resolvable:$true] %s19_s16 }
   0x3   :  { %s50_s17 = scalar_lea.hbm %s17_s14, 16  ;;  %s52_s20 = scalar_lea.hbm %s142_s1, 256 }
   0x4   :  { %p51_p0 = scmp.ne.s32.totalorder %s17_s14, %s50_s17  ;;  %p53_p1 = scmp.lt.u32.totalorder %s17_s14, %s142_s1 }
   0x5   :  { %p54_p2 = scmp.lt.u32.totalorder %s52_s20, %s50_s17  ;;  %p56_p4 = scmp.lt.u32.totalorder %s50_s17, %s17_s14 }
   0x7   :  { %p55_p3 = por %p54_p2, %p53_p1 }
   0x9   :  { %p57_p5 = por %p56_p4, %p55_p3 }
   0xb   :  { %p58_p6 = pnand %p57_p5, %p51_p0 }
   0xd   :  { %61 = shalt.err (!%p58_p6)
}
   0xe   :  { %s62_s0 = scalar_lea.vmem %s20_s16, 16  ;;  %s66_s23 = scalar_lea.vmem %s20_s16, 32 }
   0xf   :  { %p63_p7 = scmp.ne.s32.totalorder %s20_s16, %s62_s0  ;;  %p67_p8 = scmp.lt.s32.totalorder %s20_s16, %s20_s16 }
  0x10   :  { %p68_p9 = scmp.lt.s32.totalorder %s66_s23, %s62_s0 }
  0x12   :  { %p69_p10 = por %p68_p9, %p67_p8 }
  0x14   :  { %p70_p11 = pnand %p69_p10, %p63_p7 }
  0x16   :  { %73 = shalt.err (!%p70_p11)
}
  0x17   :  { %22 = dma.hbm_to_vmem [thread:$0]  %s17_s14, 16, %s20_s16, [#allocation5]  }
  0x18   :  { %96 = dma.done.wait [#allocation5], 16  }
  0x19   :  { %97 = vsyncadd [#allocation5], 4294967280  ;;  %s101_s24 = smov [#allocation7]   ;;  %vm28_vm0 = vcmask 253952   ;;  %v27_v0 = vld [vmem:[#allocation4] sm:$0x1] }
  0x1a   :  { %s36_s25 = sshll.u32 %s101_s24, 4  ;;  %29 = vst.msk [vmem:[#allocation7] sm:$0x1] %vm28_vm0, %v27_v0  ;;  %s37_s25 = int_to_ptr.vmem [resolvable:$true] %s36_s25 }
  0x1b   :  { %s74_s1 = scalar_lea.vmem %s37_s25, 16  ;;  %s78_s26 = scalar_lea.vmem %s37_s25, 32 }
  0x1c   :  { %p75_p12 = scmp.ne.s32.totalorder %s37_s25, %s74_s1  ;;  %p79_p13 = scmp.lt.s32.totalorder %s37_s25, %s37_s25 }
  0x1d   :  { %p80_p0 = scmp.lt.s32.totalorder %s78_s26, %s74_s1 }
  0x1f   :  { %p81_p1 = por %p80_p0, %p79_p13 }
  0x21   :  { %p82_p2 = pnand %p81_p1, %p75_p12 }
  0x23   :  { %85 = shalt.err (!%p82_p2)
}
  0x24   :  { %s86_s29 = scalar_lea.hbm %s143_s2, 16 }
  0x25   :  { %p87_p3 = scmp.ne.s32.totalorder %s143_s2, %s86_s29  ;;  %p90_p4 = scmp.lt.u32.totalorder %s86_s29, %s143_s2 }
  0x27   :  { %p92_p5 = pnand %p90_p4, %p87_p3 }
  0x29   :  { %95 = shalt.err (!%p92_p5)
}
  0x2a   :  { %39 = dma.vmem_to_hbm [thread:$0]  %s37_s25, 16, %s143_s2, [#allocation6]  }
  0x2b   :  { %98 = dma.done.wait [#allocation6], 16  }
  0x2c   :  { %99 = vsyncadd [#allocation6], 4294967280 }
  0x2d   :  { %43 = vsyncpa [#allocation5], 1 }
  0x2e   :  { %44 = vsyncpa [#allocation6], 1 }

</bundles_post_ra>
